<compile_context>
chip_gen: v7x
topology: tpu7x:2x2x1
jax: 0.10.0
libtpu: 0.0.40
codegen_flags: <defaults>
</compile_context>

<pallas_src>
import jax
import jax.numpy as jnp
from jax import lax
from jax.experimental import pallas as pl
from jax.experimental.pallas import tpu as pltpu

LANE = 128
MAX_TILE_ROWS = 8192                    # (8192, 128) f32 = 4 MiB per input block
VMEM_LIMIT_BYTES = 32 * 1024 * 1024     # covers v5e's 16 MiB default; <= physical on all gens
SMALL_INPUT_ELEMS = 256 * 1024          # below ~1 MiB of f32: plain XLA reduction is faster


def _make_mse_kernel(tile_rows, tiles_per_split, rows, needs_mask):
    """Builds the sum-of-squared-differences kernel for a fixed tiling."""

    def kernel(p_ref, t_ref, out_ref, acc_ref):
        # acc_ref: (1, LANE) f32 VMEM, per-core, resident across the reduction axis j.
        # out_ref: (1, 1) f32 SMEM block holding this split's partial sum.
        j = pl.program_id(1)

        @pl.when(j == 0)
        def _init():
            acc_ref[...] = jnp.zeros_like(acc_ref)

        # Cast to f32 inside the kernel (inputs arrive in their native dtype).
        d = p_ref[...].astype(jnp.float32) - t_ref[...].astype(jnp.float32)
        sq = d * d

        if needs_mask:
            # Zero rows past the true row count. Covers both a partial boundary
            # block and whole "phantom" tiles introduced by the 2-way core split
            # (their index_map is clamped onto the last real block).
            tile = pl.program_id(0) * tiles_per_split + j
            row = tile * tile_rows + lax.broadcasted_iota(jnp.int32, sq.shape, 0)
            sq = jnp.where(row < rows, sq, 0.0)

        # Per-step partial sums: sublane reduce into a lane-wide vector accumulator.
        acc_ref[...] += jnp.sum(sq, axis=0, keepdims=True)

        # Single cross-lane reduce + scalar store, once per split.
        @pl.when(j == pl.num_programs(1) - 1)
        def _fin():
            out_ref[0, 0] = jnp.sum(acc_ref[...])

    return kernel


def mse_loss(y_pred, y_true, *,
             small_input_elems=SMALL_INPUT_ELEMS,
             max_tile_rows=MAX_TILE_ROWS):
    """Equivalent of the PyTorch MSE module's forward.

    Both tensors are flattened, all math is done in float32, and the mean
    squared error over all elements is returned as a float32 scalar.
    """
    y_pred = jnp.asarray(y_pred)
    y_true = jnp.asarray(y_true)

    p = y_pred.reshape(-1)
    t = y_true.reshape(-1)
    n = p.shape[0]
    assert t.shape[0] == n, "y_pred and y_true must have the same number of elements"

    # Small-input fast path: pallas_call fixed overhead dominates tiny tensors.
    if n < LANE or n <= small_input_elems:
        d = p.astype(jnp.float32) - t.astype(jnp.float32)
        return jnp.sum(d * d) / jnp.float32(n)

    # Main (lane-aligned) part goes through the kernel; the <=127-element tail is
    # handled in glue so we never materialize a padded copy of the full inputs.
    # (For typical ML sizes n % 128 == 0 and the slices below are identity.)
    n_main = (n // LANE) * LANE
    tail = n - n_main
    p_main = p[:n_main] if tail else p
    t_main = t[:n_main] if tail else t
    rows = n_main // LANE
    p2 = p_main.reshape(rows, LANE)
    t2 = t_main.reshape(rows, LANE)

    # Tile choice: biggest block that fits comfortably in scoped VMEM on all
    # generations; small inputs use a single full-extent block.
    tile_rows = rows if rows <= max_tile_rows else max_tile_rows
    num_tiles = pl.cdiv(rows, tile_rows)

    # Always split the "parallel" leading axis 2 ways when there is more than one
    # tile, so v7x (2 TCs/chip) keeps both cores busy even for odd tile counts.
    # On 1-TC chips (v5e/v6e) this is just a harmless 2-iteration outer loop.
    # TODO(synk): if a v7x profile shows one idle core, switch this axis to
    # pltpu.CORE_PARALLEL.
    nsplit = 2 if num_tiles >= 2 else 1
    tiles_per_split = pl.cdiv(num_tiles, nsplit)
    padded_tiles = nsplit * tiles_per_split

    # Mask needed for a partial boundary block and/or phantom tiles.
    needs_mask = (padded_tiles * tile_rows != rows)

    kernel = _make_mse_kernel(tile_rows, tiles_per_split, rows, needs_mask)

    last_block = num_tiles - 1

    def in_map(c, j):
        # Clamp phantom tiles onto the last real block; their contribution is
        # zeroed by the in-kernel row mask.
        return (jnp.minimum(c * tiles_per_split + j, last_block), 0)

    cost = pl.CostEstimate(
        flops=3 * n_main,                                   # sub + mul + add per element
        bytes_accessed=int(p2.nbytes) + int(t2.nbytes) + 4 * nsplit,
        transcendentals=0,
    )

    partials = pl.pallas_call(
        kernel,
        out_shape=jax.ShapeDtypeStruct((nsplit, 1), jnp.float32),
        grid=(nsplit, tiles_per_split),
        in_specs=[
            pl.BlockSpec((tile_rows, LANE), in_map),
            pl.BlockSpec((tile_rows, LANE), in_map),
        ],
        out_specs=pl.BlockSpec((1, 1), lambda c, j: (c, 0),
                               memory_space=pltpu.SMEM),
        scratch_shapes=[pltpu.VMEM((1, LANE), jnp.float32)],
        compiler_params=pltpu.CompilerParams(
            dimension_semantics=("parallel", "arbitrary"),
            vmem_limit_bytes=VMEM_LIMIT_BYTES),
        cost_estimate=cost,
    )(p2, t2)

    total = jnp.sum(partials)

    if tail:
        dt = p[n_main:].astype(jnp.float32) - t[n_main:].astype(jnp.float32)
        total = total + jnp.sum(dt * dt)

    # Mean over the true element count.
    return total / jnp.float32(n)


if __name__ == "__main__":
    key = jax.random.PRNGKey(0)
    k1, k2, k3, k4, k5, k6 = jax.random.split(key, 6)

    def ref_mse(a, b):
        d = a.reshape(-1).astype(jnp.float32) - b.reshape(-1).astype(jnp.float32)
        return jnp.mean(d * d)

    # Test A: small shape consistent with a typical prediction tensor (NCHW-ish).
    # Force the Pallas path (the default small-input fast path would route this
    # tiny demo tensor through plain XLA).
    y_pred = jax.random.normal(k1, (2, 4, 16, 16), dtype=jnp.float32)
    y_true = jax.random.normal(k2, (2, 4, 16, 16), dtype=jnp.float32)
    loss = mse_loss(y_pred, y_true, small_input_elems=0)
    jax.block_until_ready(loss)
    assert jnp.allclose(loss, ref_mse(y_pred, y_true), rtol=1e-5, atol=1e-6)

    # Default path (small-input fast path) must agree.
    loss_fast = mse_loss(y_pred, y_true)
    jax.block_until_ready(loss_fast)
    assert jnp.allclose(loss_fast, ref_mse(y_pred, y_true), rtol=1e-5, atol=1e-6)

    # Test B: odd tile count + partial boundary block, tiny tiles to exercise the
    # 2-way split / phantom-tile clamp / row-mask machinery at small sizes.
    a = jax.random.normal(k3, (2, 4, 16, 17), dtype=jnp.float32)   # 2176 elems -> 17 rows
    b = jax.random.normal(k4, (2, 4, 16, 17), dtype=jnp.float32)
    lb = mse_loss(a, b, small_input_elems=0, max_tile_rows=8)
    jax.block_until_ready(lb)
    assert jnp.allclose(lb, ref_mse(a, b), rtol=1e-5, atol=1e-6)

    # Test C: ragged size (n % 128 != 0) -> in-glue tail path + masked kernel.
    c1 = jax.random.normal(k5, (3, 5, 7, 11), dtype=jnp.float32)   # 1155 elems
    c2 = jax.random.normal(k6, (3, 5, 7, 11), dtype=jnp.float32)
    lc = mse_loss(c1, c2, small_input_elems=0, max_tile_rows=8)
    jax.block_until_ready(lc)
    assert jnp.allclose(lc, ref_mse(c1, c2), rtol=1e-5, atol=1e-6)

    print("KERNEL_OK")
</pallas_src>

<mosaic_0001>
module attributes {stable_mosaic.version = 11 : i64} {
  func.func @kernel(%arg0: i32, %arg1: i32, %arg2: memref<16x128xf32, #tpu.memory_space<vmem>>, %arg3: memref<16x128xf32, #tpu.memory_space<vmem>>, %arg4: memref<1x1xf32, #tpu.memory_space<smem>>, %arg5: memref<1x128xf32, #tpu.memory_space<vmem>>) attributes {dimension_semantics = [#tpu.dimension_semantics<parallel>, #tpu.dimension_semantics<arbitrary>], iteration_bounds = array<i64: 1, 1>, scalar_prefetch = 0 : i64, scratch_operands = 1 : i64, tpu.core_type = #tpu.core_type<tc>, window_params = [{transform_indices = @transform_0, window_bounds = array<i64: 16, 128>}, {transform_indices = @transform_1, window_bounds = array<i64: 16, 128>}, {transform_indices = @transform_2, window_bounds = array<i64: 1, 1>}]} {
    %c0_i32 = arith.constant 0 : i32
    %0 = arith.cmpi eq, %arg1, %c0_i32 : i32
    %1 = arith.extui %0 : i1 to i32
    %c0_i32_0 = arith.constant 0 : i32
    %2 = arith.cmpi ne, %1, %c0_i32_0 : i32
    scf.if %2 {
      %cst_10 = arith.constant 0.000000e+00 : f32
      %15 = vector.broadcast %cst_10 : f32 to vector<1x128xf32>
      %c0_11 = arith.constant 0 : index
      %c0_12 = arith.constant 0 : index
      %16 = vector.load %arg5[%c0_11, %c0_12] : memref<1x128xf32, #tpu.memory_space<vmem>>, vector<1x128xf32>
      tpu.vector_store %arg5[%c0_11, %c0_12], %15 {strides = array<i32>} : memref<1x128xf32, #tpu.memory_space<vmem>>, vector<1x128xf32>,
    } else {
    }
    %c0 = arith.constant 0 : index
    %c0_1 = arith.constant 0 : index
    %3 = vector.load %arg2[%c0, %c0_1] : memref<16x128xf32, #tpu.memory_space<vmem>>, vector<16x128xf32>
    %c0_2 = arith.constant 0 : index
    %c0_3 = arith.constant 0 : index
    %4 = vector.load %arg3[%c0_2, %c0_3] : memref<16x128xf32, #tpu.memory_space<vmem>>, vector<16x128xf32>
    %5 = arith.subf %3, %4 : vector<16x128xf32>
    %6 = arith.mulf %5, %5 : vector<16x128xf32>
    %c0_4 = arith.constant 0 : index
    %c0_5 = arith.constant 0 : index
    %7 = vector.load %arg5[%c0_4, %c0_5] : memref<1x128xf32, #tpu.memory_space<vmem>>, vector<1x128xf32>
    %cst = arith.constant dense<0.000000e+00> : vector<128xf32>
    %8 = vector.multi_reduction <add>, %6, %cst [0] : vector<16x128xf32> to vector<128xf32>
    %9 = vector.shape_cast %8 : vector<128xf32> to vector<1x128xf32>
    %10 = arith.addf %7, %9 : vector<1x128xf32>
    %c0_6 = arith.constant 0 : index
    %c0_7 = arith.constant 0 : index
    %11 = vector.load %arg5[%c0_6, %c0_7] : memref<1x128xf32, #tpu.memory_space<vmem>>, vector<1x128xf32>
    tpu.vector_store %arg5[%c0_6, %c0_7], %10 {strides = array<i32>} : memref<1x128xf32, #tpu.memory_space<vmem>>, vector<1x128xf32>,
    %c0_i32_8 = arith.constant 0 : i32
    %12 = arith.cmpi eq, %arg1, %c0_i32_8 : i32
    %13 = arith.extui %12 : i1 to i32
    %c0_i32_9 = arith.constant 0 : i32
    %14 = arith.cmpi ne, %13, %c0_i32_9 : i32
    scf.if %14 {
      %c0_10 = arith.constant 0 : index
      %c0_11 = arith.constant 0 : index
      %15 = vector.load %arg5[%c0_10, %c0_11] : memref<1x128xf32, #tpu.memory_space<vmem>>, vector<1x128xf32>
      %16 = vector.shape_cast %15 : vector<1x128xf32> to vector<1x1x128xf32>
      %cst_12 = arith.constant dense<0.000000e+00> : vector<1xf32>
      %17 = vector.multi_reduction <add>, %16, %cst_12 [1, 2] : vector<1x1x128xf32> to vector<1xf32>
      %18 = vector.shape_cast %17 : vector<1xf32> to vector<1x1x1xf32>
      %19 = vector.extract %18[0, 0, 0] : f32 from vector<1x1x1xf32>
      %c0_13 = arith.constant 0 : index
      %c0_14 = arith.constant 0 : index
      %20 = memref.load %arg4[%c0_13, %c0_14] : memref<1x1xf32, #tpu.memory_space<smem>>
      memref.store %19, %arg4[%c0_13, %c0_14] : memref<1x1xf32, #tpu.memory_space<smem>>
    } else {
    }
    return
  }
  func.func @transform_0(%arg0: i32, %arg1: i32) -> (i32, i32) {
    %c1_i32 = arith.constant 1 : i32
    %0 = arith.muli %arg0, %c1_i32 : i32
    %1 = arith.addi %0, %arg1 : i32
    %c0_i32 = arith.constant 0 : i32
    %2 = arith.minsi %1, %c0_i32 : i32
    %c0_i32_0 = arith.constant 0 : i32
    %c0_i32_1 = arith.constant 0 : i32
    return %2, %c0_i32_0 : i32, i32
  }
  func.func @transform_1(%arg0: i32, %arg1: i32) -> (i32, i32) {
    %c1_i32 = arith.constant 1 : i32
    %0 = arith.muli %arg0, %c1_i32 : i32
    %1 = arith.addi %0, %arg1 : i32
    %c0_i32 = arith.constant 0 : i32
    %2 = arith.minsi %1, %c0_i32 : i32
    %c0_i32_0 = arith.constant 0 : i32
    %c0_i32_1 = arith.constant 0 : i32
    return %2, %c0_i32_0 : i32, i32
  }
  func.func @transform_2(%arg0: i32, %arg1: i32) -> (i32, i32) {
    %c0_i32 = arith.constant 0 : i32
    %c0_i32_0 = arith.constant 0 : i32
    return %arg0, %c0_i32 : i32, i32
  }
}

</mosaic_0001>

<bundles_post_ra>
// kernel: tpu_custom_call.1
= control target key start
LH: loop header
LB: loop body
LE: loop exit
PB: predicated region body
PF: predicated region fallthrough
CT: control target
= control target key end

     0   :  { %7 = vsyncpa [#allocation4], 0  ;;  %s244_s0 = inlined_call_operand.hbm [shape: f32[16,128], index: 0, kind: input, shape index: {}]   ;;  %s245_s1 = inlined_call_operand.hbm [shape: f32[16,128], index: 1, kind: input, shape index: {}]   ;;  %s246_s2 = inlined_call_operand.hbm [shape: f32[1,1], index: 2, kind: output, shape index: {}]  }
   0x1   :  { %8 = vsyncpa [#allocation7], 0 }
   0x2   :  { %9 = vsyncpa [#allocation5], 0  ;;  %s187_s9 = smov [#allocation3]   ;;  %s127_s13 = scalar_lea.hbm %s244_s0, 256 }
   0x3   :  { %s21_s10 = sshll.u32 %s187_s9, 4  ;;  %p128_p0 = scmp.ne.s32.totalorder %s244_s0, %s127_s13  ;;  %s22_s10 = int_to_ptr.vmem [resolvable:$true] %s21_s10 }
   0x4   :  { %p131_p1 = scmp.lt.u32.totalorder %s127_s13, %s244_s0 }
   0x6   :  { %p133_p2 = pnand %p131_p1, %p128_p0 }
   0x8   :  { %136 = shalt.err (!%p133_p2)
}
   0x9   :  { %s137_s18 = scalar_lea.vmem %s22_s10, 256  ;;  %p142_p4 = scmp.lt.s32.totalorder %s22_s10, %s22_s10 }
   0xa   :  { %p138_p3 = scmp.ne.s32.totalorder %s22_s10, %s137_s18  ;;  %p143_p5 = scmp.lt.s32.totalorder %s137_s18, %s137_s18 }
   0xc   :  { %p144_p6 = por %p143_p5, %p142_p4 }
   0xe   :  { %p145_p7 = pnand %p144_p6, %p138_p3 }
  0x10   :  { %148 = shalt.err (!%p145_p7)
}
  0x11   :  { %s188_s19 = smov 128   ;;  %s189_s20 = smov 8  }
  0x12   :  { %27 = dma.hbm_to_vmem [thread:$0]  %s244_s0, 256, %s22_s10, [#allocation4], %s188_s19, %s188_s19, %s189_s20  }
  0x13   :  { %s190_s23 = smov [#allocation6]   ;;  %s149_s27 = scalar_lea.hbm %s245_s1, 256 }
  0x14   :  { %s39_s24 = sshll.u32 %s190_s23, 4  ;;  %p150_p8 = scmp.ne.s32.totalorder %s245_s1, %s149_s27  ;;  %s40_s24 = int_to_ptr.vmem [resolvable:$true] %s39_s24 }
  0x15   :  { %p153_p9 = scmp.lt.u32.totalorder %s149_s27, %s245_s1 }
  0x17   :  { %p155_p10 = pnand %p153_p9, %p150_p8 }
  0x19   :  { %158 = shalt.err (!%p155_p10)
}
  0x1a   :  { %s159_s4 = scalar_lea.vmem %s40_s24, 256  ;;  %p164_p12 = scmp.lt.s32.totalorder %s40_s24, %s40_s24 }
  0x1b   :  { %p160_p11 = scmp.ne.s32.totalorder %s40_s24, %s159_s4  ;;  %p165_p13 = scmp.lt.s32.totalorder %s159_s4, %s159_s4 }
  0x1d   :  { %p166_p0 = por %p165_p13, %p164_p12 }
  0x1f   :  { %p167_p1 = pnand %p166_p0, %p160_p11 }
  0x21   :  { %170 = shalt.err (!%p167_p1)
}
  0x22   :  { %45 = dma.hbm_to_vmem [thread:$0]  %s245_s1, 256, %s40_s24, [#allocation7], %s188_s19, %s188_s19, %s189_s20  }
  0x23   :  { %181 = dma.done.wait [#allocation4], 256  }
  0x24   :  { %182 = vsyncadd [#allocation4], 4294967040 }
  0x25   :  { %183 = dma.done.wait [#allocation7], 256  }
  0x26   :  { %184 = vsyncadd [#allocation7], 4294967040  ;;  %v191_v0 = vmov 0.0   ;;  %v65_v1 = vld [vmem:[#allocation3] sm:$0xff]  ;;  %v66_v2 = vld [vmem:[#allocation3 + $0x8] sm:$0xff]  ;;  %vm87_vm0 = vcmask 1040384  }
  0x27   :  { %64 = vst [vmem:[#allocation2] sm:$0x1] %v191_v0  ;;  %v67_v3 = vld [vmem:[#allocation6] sm:$0xff]  ;;  %v68_v4 = vld [vmem:[#allocation6 + $0x8] sm:$0xff]  ;;  %s171_s8 = scalar_lea.hbm %s246_s2, 16 }
  0x28   :  { %v69_v5 = vsub.f32 %v65_v1, %v67_v3  ;;  %v70_v6 = vsub.f32 %v66_v2, %v68_v4  ;;  %p172_p2 = scmp.ne.s32.totalorder %s246_s2, %s171_s8  ;;  %p175_p3 = scmp.lt.u32.totalorder %s171_s8, %s246_s2 }
  0x2a   :  { %v71_v7 = vmul.f32 %v69_v5, %v69_v5  ;;  %v72_v8 = vmul.f32 %v70_v6, %v70_v6  ;;  %p177_p4 = pnand %p175_p3, %p172_p2 }
  0x2c   :  { %v74_v9 = vadd.f32 %v72_v8, %v71_v7 }
  0x2e   :  { %v75_v10 = vrot.slane %v74_v9, 4  ;;  %v73_v15 = vld [vmem:[#allocation2] sm:$0x1] }
  0x30   :  { %v76_v11 = vadd.f32 %v75_v10, %v74_v9 }
  0x32   :  { %v77_v12 = vrot.slane %v76_v11, 2 }
  0x34   :  { %v78_v13 = vadd.f32 %v77_v12, %v76_v11 }
  0x36   :  { %v79_v14 = vrot.slane %v78_v13, 1 }
  0x38   :  { %v80_v16 = vadd.f32 %v79_v14, %v78_v13 }
  0x3a   :  { %v81_v17 = vadd.f32 %v80_v16, %v73_v15 }
  0x3c   :  { %82 = vst [vmem:[#allocation2] sm:$0x1] %v81_v17 }
  0x43   :  { %v86_v18 = vld [vmem:[#allocation2] sm:$0x1] }
  0x44   :  { %v88_v19 = vsel %vm87_vm0, %v86_v18, 0.0 }
  0x45   :  { %89 = vadd.xlane.f32.xlu0 %v88_v19 }
  0xd2   :  { %v90_v20 = vpop.xlane.xlu0 %89 }
  0xd3   :  { %v91_v21 = vrot.slane %v90_v20, 4 }
  0xd5   :  { %v92_v22 = vadd.f32 %v91_v21, %v90_v20 }
  0xd7   :  { %v93_v23 = vrot.slane %v92_v22, 2 }
  0xd9   :  { %v94_v24 = vadd.f32 %v93_v23, %v92_v22 }
  0xdb   :  { %v95_v25 = vrot.slane %v94_v24, 1 }
  0xdd   :  { %v96_v26 = vadd.f32 %v95_v25, %v94_v24 }
  0xdf   :  { %119 = vpush %v96_v26 }
 0x110   :  { %s120_s1 = spop %119 }
 0x111   :  { %99 = sst [smem:[#allocation8]] %s120_s1 }
 0x112   :  { %180 = shalt.err (!%p177_p4)
}
 0x113   :  { %s192_s13 = smov [#allocation8]  }
 0x114   :  { %107 = dma.smem_to_hbm %s192_s13, 16, %s246_s2, [#allocation5]  }
 0x115   :  { %185 = dma.done.wait [#allocation5], 16  }
 0x116   :  { %186 = vsyncadd [#allocation5], 4294967280 }
 0x117   :  { %111 = sfence }
 0x118   :  { %112 = vsyncpa [#allocation4], 1 }
 0x119   :  { %113 = vsyncpa [#allocation7], 1 }
 0x11a   :  { %114 = vsyncpa [#allocation5], 1 }

</bundles_post_ra>
